<compile_context>
chip_gen: v5e
topology: v5e:2x2
jax: 0.10.0
libtpu: 0.0.40
codegen_flags: <defaults>
</compile_context>

<pallas_src>
import functools

import jax
import jax.numpy as jnp
from jax.experimental import pallas as pl
from jax.experimental.pallas import tpu as pltpu

# ---- module constants (from FocusedVisualEncoding / PrimaryVisualEncoding) ----
MAIN_CROP_SIZE = 24
DEEP_CROP_SIZE = 3
FINAL_CROP_SIZE = MAIN_CROP_SIZE // 2 ** 2          # 6
BASE_DEPTH = 32
PRIMARY_FINAL_DEPTH = 96
FINAL_DEPTH = BASE_DEPTH + PRIMARY_FINAL_DEPTH      # 128
ENC_SIZE = 256
DIV_FACTOR = 8
DEPADDING = 2
PRIMARY_FINAL_H = 144 // DIV_FACTOR                 # 18
PRIMARY_FINAL_W = 256 // DIV_FACTOR                 # 32

# ---- derived constants (de-padding exploitation) ----
POOL = 4                                     # two stride-2 avg-pools == one 4x4 mean
KEEP = FINAL_CROP_SIZE - 2 * DEPADDING       # 2   surviving pooled cells per dim
N_CELLS = KEEP * KEEP                        # 4   surviving pooled cells per image
STEM_OUT = KEEP * POOL                       # 8   surviving stem-conv rows/cols
CONV_PAD = 2                                 # 5x5 'same' halo
STEM_WIN = STEM_OUT + 2 * CONV_PAD           # 12  input window (incl. halo)
INTERIOR_OFF = DEPADDING * POOL - CONV_PAD   # 6   window offset inside the 24x24 crop
K_RAW = 3 * 5 * 5                            # 75  im2col depth
K_PAD = 128                                  # zero-padded contraction depth


def _silu(v):
    # silu(v) = v * sigmoid(v); exp and the approximate reciprocal both run on the EUP,
    # freeing VALU slots.  All silu math stays in f32 (v5e has no bf16 VPU/EUP path).
    return v * pl.reciprocal(1.0 + jnp.exp(-v), approx=True)


# ----------------------------- fused Pallas kernel ----------------------------
def _fused_kernel(p_ref, ws_ref, bpd_ref, we_ref, be_ref, o_ref, *, tile_b):
    """(pre-pooled) stem matmul -> (+deep,+bias) silu -> expand matmul -> silu -> mean."""
    rows = N_CELLS * tile_b                   # 4 * tile_b pooled-cell rows

    # Stem 5x5 conv, already 4x4-avg-pooled via linearity in the wrapper, as one MXU
    # matmul (the 1/16 pooling scale is folded into ws).  Columns 0..31 hold the stem
    # output, 32..127 are zero, matching the concat([stem32, deep96]) channel layout.
    p = p_ref[...].reshape(rows, K_PAD)                                # bf16
    pooled = jnp.dot(p, ws_ref[...], preferred_element_type=jnp.float32)  # (rows,128) f32

    # Add (zeros32 | deep96) + pre_act_bias, broadcast over the 4 surviving cells
    # (rows are ordered cell-major, so this is a leading-axis broadcast), then SiLU.
    a = _silu(pooled.reshape(N_CELLS, tile_b, FINAL_DEPTH) + bpd_ref[...][None, :, :])

    # 1x1 expand conv (matmul) + bias, SiLU.
    z = jnp.dot(a.reshape(rows, FINAL_DEPTH).astype(we_ref.dtype), we_ref[...],
                preferred_element_type=jnp.float32) + be_ref[...]      # (rows, 256) f32
    z = _silu(z)

    # Per-image spatial mean over the surviving 2x2 cells: 3 full-tile VPU adds.
    out = jnp.sum(z.reshape(N_CELLS, tile_b, ENC_SIZE), axis=0) * (1.0 / N_CELLS)
    o_ref[...] = out.astype(o_ref.dtype)                               # (tile_b, 256)


def _pick_tile_b(batch):
    # As few grid steps as possible: each step costs ~0.35us fixed overhead while the
    # per-step compute here is tiny, and on v5e/v6e the grid is a purely serial loop.
    # With pre-pooled patches a block of t images is only ~t*2.5 KiB of operands, so
    # a 1024-image block (double-buffered) stays far below v7x's 32 MiB scoped VMEM.
    if batch <= 1024:
        return batch
    for t in range(1024, 7, -8):          # largest multiple-of-8 divisor <= 1024
        if batch % t == 0:
            return t
    return batch                          # no clean divisor: single (larger) block


def _fused_tail(patches, w_stem, bpd, w_exp, b_exp):
    """patches:(4,B,128) bf16, w_stem:(128,128) bf16, bpd:(B,128) f32,
       w_exp:(128,256) bf16, b_exp:(1,256) f32  ->  (B, ENC_SIZE) f32."""
    B = patches.shape[1]
    tile_b = _pick_tile_b(B)
    grid = (B // tile_b,)
    kernel = functools.partial(_fused_kernel, tile_b=tile_b)
    return pl.pallas_call(
        kernel,
        out_shape=jax.ShapeDtypeStruct((B, ENC_SIZE), jnp.float32),
        grid=grid,
        in_specs=[
            pl.BlockSpec((N_CELLS, tile_b, K_PAD), lambda i: (0, i, 0)),   # patches
            pl.BlockSpec((K_PAD, FINAL_DEPTH), lambda i: (0, 0)),          # stem W (padded)
            pl.BlockSpec((tile_b, FINAL_DEPTH), lambda i: (i, 0)),         # deep+bias (B,128)
            pl.BlockSpec((FINAL_DEPTH, ENC_SIZE), lambda i: (0, 0)),       # expand W
            pl.BlockSpec((1, ENC_SIZE), lambda i: (0, 0)),                 # expand bias
        ],
        out_specs=pl.BlockSpec((tile_b, ENC_SIZE), lambda i: (i, 0)),
        compiler_params=pltpu.CompilerParams(dimension_semantics=("parallel",)),
    )(patches, w_stem, bpd, w_exp, b_exp)


# ------------------------------ parameter init -------------------------------
def init_params(key):
    k_stem, k_expw, k_expb = jax.random.split(key, 3)
    # stem: Conv2d(3, 32, 5, padding=2, bias=False) with RGB-mean weight tying.
    stem_w = jax.random.normal(k_stem, (BASE_DEPTH, 3, 5, 5), jnp.float32) * (
        1.0 / (3 * 25) ** 0.5
    )
    rgb_mean = stem_w.mean(axis=1, keepdims=True)
    stem_w = jnp.broadcast_to(rgb_mean, stem_w.shape)               # all 3 channels = mean
    # matmul layout (ci, ky, kx) x co  -- matches conv_general_dilated_patches ordering.
    w_mat = jnp.transpose(stem_w, (1, 2, 3, 0)).reshape(K_RAW, BASE_DEPTH)
    # Fold the 4x4 avg-pool scale into the stem weight (pool-before-matmul linearity).
    w_mat = w_mat * (1.0 / (POOL * POOL))
    # Zero-pad K 75->128 and N 32->128 so the stem output is lane-dense and already in
    # the concat([stem32, deep96]) channel layout.
    w_stem = jnp.zeros((K_PAD, FINAL_DEPTH), jnp.float32).at[:K_RAW, :BASE_DEPTH].set(w_mat)
    w_stem = w_stem.astype(jnp.bfloat16)
    # pre-activation bias (1, FINAL_DEPTH, 1, 1) -> (1, 128)
    pre_bias = jnp.zeros((1, FINAL_DEPTH), jnp.float32)
    # expand: Conv2d(128, 256, 1, bias=True); init_std unavailable -> 1/sqrt(fan_in)
    exp_w = jax.random.normal(k_expw, (ENC_SIZE, FINAL_DEPTH), jnp.float32) * (
        1.0 / FINAL_DEPTH ** 0.5
    )
    w_exp = exp_w.T.astype(jnp.bfloat16)                            # (128, 256)
    b_exp = jax.random.normal(k_expb, (1, ENC_SIZE), jnp.float32) * 0.01
    return dict(w_stem=w_stem, pre_bias=pre_bias, w_exp=w_exp, b_exp=b_exp)


# -------------------------------- forward pass -------------------------------
@jax.jit
def focused_visual_encoding(x, x_deep, focal_points, params):
    """x: (B,3,H,W) NCHW, x_deep: (B,96,Hd,Wd) NCHW, focal_points: (B,2) int32 (y,x)."""
    B, _, H, W = x.shape
    _, CD, HD, WD = x_deep.shape
    fp = focal_points.astype(jnp.int32)

    # --- main crop: only the 12x12 interior window whose outputs survive de-padding ---
    # TODO(synk): batch_crop(naive=True) source unavailable; assuming centered+clamped.
    y0 = jnp.clip(fp[:, 0] - MAIN_CROP_SIZE // 2, 0, H - MAIN_CROP_SIZE) + INTERIOR_OFF
    x0 = jnp.clip(fp[:, 1] - MAIN_CROP_SIZE // 2, 0, W - MAIN_CROP_SIZE) + INTERIOR_OFF

    def crop_one(img, yy, xx):
        return jax.lax.dynamic_slice(img, (jnp.int32(0), yy, xx), (3, STEM_WIN, STEM_WIN))

    crop = jax.vmap(crop_one)(x, y0, x0)                 # (B,3,12,12)
    crop = jnp.transpose(crop, (0, 2, 3, 1))             # (B,12,12,3) NHWC

    # im2col in one XLA op; feature order is (ci, kh, kw) with ci slowest.
    patches = jax.lax.conv_general_dilated_patches(
        crop, filter_shape=(5, 5), window_strides=(1, 1), padding="VALID",
        dimension_numbers=("NHWC", "HWIO", "NHWC"))      # (B, 8, 8, 75)

    # Pool-before-matmul: sum the 16 patch rows of each surviving pooled cell in f32
    # (exact, by linearity of the conv), order rows cell-major, pad K 75->128, cast bf16.
    ps = patches.reshape(B, KEEP, POOL, KEEP, POOL, K_RAW).sum(axis=(2, 4))   # (B,2,2,75)
    ps = jnp.transpose(ps.reshape(B, N_CELLS, K_RAW), (1, 0, 2))              # (4,B,75)
    ps = jnp.pad(ps, ((0, 0), (0, 0), (0, K_PAD - K_RAW))).astype(jnp.bfloat16)

    # --- deep features: only the centre pixel of the 3x3 crop survives the ---------
    # --- nearest x8 upsample + de-padding (it is spatially constant there). --------
    fpd = fp // DIV_FACTOR
    yd = jnp.clip(fpd[:, 0] - DEEP_CROP_SIZE // 2, 0, HD - DEEP_CROP_SIZE) + DEEP_CROP_SIZE // 2
    xd = jnp.clip(fpd[:, 1] - DEEP_CROP_SIZE // 2, 0, WD - DEEP_CROP_SIZE) + DEEP_CROP_SIZE // 2

    def deep_one(img, yy, xx):
        return jax.lax.dynamic_slice(img, (jnp.int32(0), yy, xx), (CD, 1, 1))[:, 0, 0]

    deep = jax.vmap(deep_one)(x_deep, yd, xd)            # (B, 96)

    # TODO(synk): preproc (3x FMBConv) and fuse (2x BResBlock + SASAtten) definitions
    # unavailable -> identity / stride-2 avg-pools; the 12x12 / centre-pixel shortcut
    # above is exact only under these placeholder (local) ops.

    # (zeros32 | deep96) + pre_act_bias, passed UN-broadcast as (B, 128); the kernel
    # broadcasts it over the 4 surviving cells for free.
    bpd = jnp.pad(deep, ((0, 0), (BASE_DEPTH, 0))) + params["pre_bias"]       # (B, 128)

    return _fused_tail(ps, params["w_stem"], bpd, params["w_exp"], params["b_exp"])


# ------------------------------------ main ------------------------------------
if __name__ == "__main__":
    key = jax.random.PRNGKey(0)
    k_x, k_deep, k_params = jax.random.split(key, 3)

    B = 2
    x = jax.random.uniform(k_x, (B, 3, 144, 256), jnp.float32)                  # screen
    x_deep = jax.random.normal(k_deep, (B, 96, PRIMARY_FINAL_H, PRIMARY_FINAL_W),
                               jnp.float32)                                     # (2,96,18,32)
    focal_points = jnp.array([[40, 100], [70, 200]], jnp.int32)                 # (y, x)

    params = init_params(k_params)
    out = focused_visual_encoding(x, x_deep, focal_points, params)
    out = jax.block_until_ready(out)

    assert out.shape == (B, ENC_SIZE), out.shape
    assert jnp.all(jnp.isfinite(out))
    print("KERNEL_OK")
</pallas_src>

<mosaic_0001>
module attributes {stable_mosaic.version = 11 : i64} {
  func.func @_fused_kernel(%arg0: i32, %arg1: memref<4x2x128xbf16, #tpu.memory_space<vmem>>, %arg2: memref<128x128xbf16, #tpu.memory_space<vmem>>, %arg3: memref<2x128xf32, #tpu.memory_space<vmem>>, %arg4: memref<128x256xbf16, #tpu.memory_space<vmem>>, %arg5: memref<1x256xf32, #tpu.memory_space<vmem>>, %arg6: memref<2x256xf32, #tpu.memory_space<vmem>>) attributes {dimension_semantics = [#tpu.dimension_semantics<parallel>], iteration_bounds = array<i64: 1>, scalar_prefetch = 0 : i64, scratch_operands = 0 : i64, tpu.core_type = #tpu.core_type<tc>, window_params = [{transform_indices = @transform_0, window_bounds = array<i64: 4, 2, 128>}, {pipeline_mode = #tpu.pipeline_mode<synchronous>, transform_indices = @transform_1, window_bounds = array<i64: 128, 128>}, {transform_indices = @transform_2, window_bounds = array<i64: 2, 128>}, {pipeline_mode = #tpu.pipeline_mode<synchronous>, transform_indices = @transform_3, window_bounds = array<i64: 128, 256>}, {pipeline_mode = #tpu.pipeline_mode<synchronous>, transform_indices = @transform_4, window_bounds = array<i64: 1, 256>}, {transform_indices = @transform_5, window_bounds = array<i64: 2, 256>}]} {
    %c0 = arith.constant 0 : index
    %c0_0 = arith.constant 0 : index
    %c0_1 = arith.constant 0 : index
    %0 = vector.load %arg1[%c0, %c0_0, %c0_1] : memref<4x2x128xbf16, #tpu.memory_space<vmem>>, vector<4x2x128xbf16>
    %1 = vector.shape_cast %0 : vector<4x2x128xbf16> to vector<8x128xbf16>
    %c0_2 = arith.constant 0 : index
    %c0_3 = arith.constant 0 : index
    %2 = vector.load %arg2[%c0_2, %c0_3] : memref<128x128xbf16, #tpu.memory_space<vmem>>, vector<128x128xbf16>
    %cst = arith.constant dense<0.000000e+00> : vector<8x128xf32>
    %3 = tpu.matmul %1, %2, %cst {dimension_numbers = #tpu.dot_dimension_numbers<[1], [0], [0], [1], [0, 0, 1, 1], [], []>} : vector<8x128xbf16>, vector<128x128xbf16>, vector<8x128xf32> -> vector<8x128xf32>
    %4 = vector.shape_cast %3 : vector<8x128xf32> to vector<4x2x128xf32>
    %c0_4 = arith.constant 0 : index
    %c0_5 = arith.constant 0 : index
    %5 = vector.load %arg3[%c0_4, %c0_5] : memref<2x128xf32, #tpu.memory_space<vmem>>, vector<2x128xf32>
    %6 = vector.shape_cast %5 : vector<2x128xf32> to vector<1x2x128xf32>
    %7 = vector.broadcast %6 : vector<1x2x128xf32> to vector<4x2x128xf32>
    %8 = arith.addf %4, %7 : vector<4x2x128xf32>
    %cst_6 = arith.constant 0.000000e+00 : f32
    %9 = vector.broadcast %cst_6 : f32 to vector<4x2x128xf32>
    %10 = arith.subf %9, %8 : vector<4x2x128xf32>
    %11 = math.exp %10 : vector<4x2x128xf32>
    %cst_7 = arith.constant 1.000000e+00 : f32
    %12 = vector.broadcast %cst_7 : f32 to vector<4x2x128xf32>
    %13 = arith.addf %12, %11 : vector<4x2x128xf32>
    %14 = tpu.reciprocal %13 {approx = true} : vector<4x2x128xf32> -> vector<4x2x128xf32>
    %15 = arith.mulf %8, %14 : vector<4x2x128xf32>
    %16 = vector.shape_cast %15 : vector<4x2x128xf32> to vector<8x128xf32>
    %17 = arith.truncf %16 : vector<8x128xf32> to vector<8x128xbf16>
    %c0_8 = arith.constant 0 : index
    %c0_9 = arith.constant 0 : index
    %18 = vector.load %arg4[%c0_8, %c0_9] : memref<128x256xbf16, #tpu.memory_space<vmem>>, vector<128x256xbf16>
    %cst_10 = arith.constant dense<0.000000e+00> : vector<8x256xf32>
    %19 = tpu.matmul %17, %18, %cst_10 {dimension_numbers = #tpu.dot_dimension_numbers<[1], [0], [0], [1], [0, 0, 1, 1], [], []>} : vector<8x128xbf16>, vector<128x256xbf16>, vector<8x256xf32> -> vector<8x256xf32>
    %c0_11 = arith.constant 0 : index
    %c0_12 = arith.constant 0 : index
    %20 = vector.load %arg5[%c0_11, %c0_12] : memref<1x256xf32, #tpu.memory_space<vmem>>, vector<1x256xf32>
    %21 = vector.broadcast %20 : vector<1x256xf32> to vector<8x256xf32>
    %22 = arith.addf %19, %21 : vector<8x256xf32>
    %cst_13 = arith.constant 0.000000e+00 : f32
    %23 = vector.broadcast %cst_13 : f32 to vector<8x256xf32>
    %24 = arith.subf %23, %22 : vector<8x256xf32>
    %25 = math.exp %24 : vector<8x256xf32>
    %cst_14 = arith.constant 1.000000e+00 : f32
    %26 = vector.broadcast %cst_14 : f32 to vector<8x256xf32>
    %27 = arith.addf %26, %25 : vector<8x256xf32>
    %28 = tpu.reciprocal %27 {approx = true} : vector<8x256xf32> -> vector<8x256xf32>
    %29 = arith.mulf %22, %28 : vector<8x256xf32>
    %30 = vector.shape_cast %29 : vector<8x256xf32> to vector<4x2x256xf32>
    %cst_15 = arith.constant dense<0.000000e+00> : vector<2x256xf32>
    %31 = vector.multi_reduction <add>, %30, %cst_15 [0] : vector<4x2x256xf32> to vector<2x256xf32>
    %cst_16 = arith.constant 2.500000e-01 : f32
    %32 = vector.broadcast %cst_16 : f32 to vector<2x256xf32>
    %33 = arith.mulf %31, %32 : vector<2x256xf32>
    %c0_17 = arith.constant 0 : index
    %c0_18 = arith.constant 0 : index
    %34 = vector.load %arg6[%c0_17, %c0_18] : memref<2x256xf32, #tpu.memory_space<vmem>>, vector<2x256xf32>
    tpu.vector_store %arg6[%c0_17, %c0_18], %33 {strides = array<i32>} : memref<2x256xf32, #tpu.memory_space<vmem>>, vector<2x256xf32>,
    return
  }
  func.func @transform_0(%arg0: i32) -> (i32, i32, i32) {
    %c0_i32 = arith.constant 0 : i32
    %c0_i32_0 = arith.constant 0 : i32
    %c0_i32_1 = arith.constant 0 : i32
    return %c0_i32, %arg0, %c0_i32_0 : i32, i32, i32
  }
  func.func @transform_1(%arg0: i32) -> (i32, i32) {
    %c0_i32 = arith.constant 0 : i32
    %c0_i32_0 = arith.constant 0 : i32
    %c0_i32_1 = arith.constant 0 : i32
    return %c0_i32, %c0_i32_0 : i32, i32
  }
  func.func @transform_2(%arg0: i32) -> (i32, i32) {
    %c0_i32 = arith.constant 0 : i32
    %c0_i32_0 = arith.constant 0 : i32
    return %arg0, %c0_i32 : i32, i32
  }
  func.func @transform_3(%arg0: i32) -> (i32, i32) {
    %c0_i32 = arith.constant 0 : i32
    %c0_i32_0 = arith.constant 0 : i32
    %c0_i32_1 = arith.constant 0 : i32
    return %c0_i32, %c0_i32_0 : i32, i32
  }
  func.func @transform_4(%arg0: i32) -> (i32, i32) {
    %c0_i32 = arith.constant 0 : i32
    %c0_i32_0 = arith.constant 0 : i32
    %c0_i32_1 = arith.constant 0 : i32
    return %c0_i32, %c0_i32_0 : i32, i32
  }
  func.func @transform_5(%arg0: i32) -> (i32, i32) {
    %c0_i32 = arith.constant 0 : i32
    %c0_i32_0 = arith.constant 0 : i32
    return %arg0, %c0_i32 : i32, i32
  }
}

</mosaic_0001>

<bundles_post_ra>
// kernel: focused_visual_encoding.1
= control target key start
LH: loop header
LB: loop body
LE: loop exit
PB: predicated region body
PF: predicated region fallthrough
CT: control target
= control target key end

     0   :  { %s731_s0 = inlined_call_operand.vmem [shape: bf16[4,2,128], index: 0, kind: input, shape index: {}]   ;;  %s732_s1 = inlined_call_operand.vmem [shape: bf16[128,128], index: 1, kind: input, shape index: {}]   ;;  %s733_s2 = inlined_call_operand.vmem [shape: f32[2,128], index: 2, kind: input, shape index: {}]   ;;  %s734_s3 = inlined_call_operand.vmem [shape: bf16[128,256], index: 3, kind: input, shape index: {}]   ;;  %s735_s4 = inlined_call_operand.vmem [shape: f32[1,256], index: 4, kind: input, shape index: {}]   ;;  %s736_s5 = inlined_call_operand.hbm [shape: f32[2,256], index: 5, kind: output, shape index: {}]  }
   0x1   :  { %v481_v0 = vld [vmem:[%s732_s1 + $0x38] sm:$0xff]  ;;  %v480_v1 = vld [vmem:[%s732_s1 + $0x30] sm:$0xff]  ;;  %v21_v2 = vld [vmem:[%s731_s0] sm:$0x1] }
   0x2   :  { %102 = vmatpush.bf16.msra.mxu0 %v481_v0  ;;  %v22_v3 = vld [vmem:[%s731_s0 + $0x1] sm:$0x1]  ;;  %v23_v4 = vld [vmem:[%s731_s0 + $0x2] sm:$0x1]  ;;  %v24_v5 = vld [vmem:[%s731_s0 + $0x3] sm:$0x1] }
   0x3   :  { %42 = vst [vmem:[#allocation1] ss:$9 sm:$0xff] %v21_v2 }
   0x4   :  { %10 = vsyncpa [#allocation3], 0  ;;  %45 = vst [vmem:[#allocation1 + $0x1] ss:$9 sm:$0xff] %v22_v3  ;;  %v479_v6 = vld [vmem:[%s732_s1 + $0x28] sm:$0xff]  ;;  %v478_v7 = vld [vmem:[%s732_s1 + $0x20] sm:$0xff] }
   0x5   :  { %48 = vst [vmem:[#allocation1 + $0x2] ss:$9 sm:$0xff] %v23_v4  ;;  %v477_v8 = vld [vmem:[%s732_s1 + $0x18] sm:$0xff]  ;;  %v476_v9 = vld [vmem:[%s732_s1 + $0x10] sm:$0xff]  ;;  %v475_v10 = vld [vmem:[%s732_s1 + $0x8] sm:$0xff]  ;;  %vm308_vm0 = vcmask 1041408  }
   0x6   :  { %103 = vmatpush.bf16.msra.mxu0 %v480_v1  ;;  %51 = vst [vmem:[#allocation1 + $0x3] ss:$9 sm:$0xff] %v24_v5  ;;  %v474_v11 = vld [vmem:[%s732_s1] sm:$0xff]  ;;  %v468_v13 = vld [vmem:[%s734_s3 + $0x70] sm:$0xf]  ;;  %vm310_vm1 = vcmask 1043458  }
   0x7   :  { %v497_v14 = vld [vmem:[%s734_s3 + $0x74] sm:$0xf0]  ;;  %v496_v15 = vld [vmem:[%s734_s3 + $0x74] sm:$0xf]  ;;  %v470_v17 = vld [vmem:[%s734_s3 + $0x78] sm:$0xf0] }
   0x8   :  { %v469_v16 = vor.u32 %v497_v14, %v468_v13  ;;  %v473_v18 = vor.u32 %v496_v15, %v470_v17  ;;  %v460_v19 = vld [vmem:[%s734_s3 + $0x60] sm:$0xf]  ;;  %v495_v20 = vld [vmem:[%s734_s3 + $0x64] sm:$0xf0]  ;;  %v494_v21 = vld [vmem:[%s734_s3 + $0x64] sm:$0xf] }
   0x9   :  { %v461_v22 = vor.u32 %v495_v20, %v460_v19  ;;  %v462_v23 = vld [vmem:[%s734_s3 + $0x68] sm:$0xf0]  ;;  %v452_v25 = vld [vmem:[%s734_s3 + $0x50] sm:$0xf]  ;;  %v493_v26 = vld [vmem:[%s734_s3 + $0x54] sm:$0xf0] }
   0xa   :  { %104 = vmatpush.bf16.msra.mxu0 %v479_v6  ;;  %267 = vmatpush.bf16.msra.mxu1 %v469_v16  ;;  %v465_v24 = vor.u32 %v494_v21, %v462_v23  ;;  %v492_v27 = vld [vmem:[%s734_s3 + $0x54] sm:$0xf]  ;;  %v453_v28 = vor.u32 %v493_v26, %v452_v25  ;;  %v454_v29 = vld [vmem:[%s734_s3 + $0x58] sm:$0xf0]  ;;  %v444_v31 = vld [vmem:[%s734_s3 + $0x40] sm:$0xf] }
   0xb   :  { %280 = vmatpush.bf16.msra.mxu2 %v473_v18  ;;  %v457_v30 = vor.u32 %v492_v27, %v454_v29  ;;  %v491_v32 = vld [vmem:[%s734_s3 + $0x44] sm:$0xf0]  ;;  %v490_v33 = vld [vmem:[%s734_s3 + $0x44] sm:$0xf]  ;;  %v446_v35 = vld [vmem:[%s734_s3 + $0x48] sm:$0xf0] }
   0xc   :  { %v445_v34 = vor.u32 %v491_v32, %v444_v31  ;;  %v449_v36 = vor.u32 %v490_v33, %v446_v35  ;;  %v436_v37 = vld [vmem:[%s734_s3 + $0x30] sm:$0xf]  ;;  %v489_v38 = vld [vmem:[%s734_s3 + $0x34] sm:$0xf0]  ;;  %v488_v39 = vld [vmem:[%s734_s3 + $0x34] sm:$0xf] }
   0xd   :  { %v52_v12 = vld [vmem:[#allocation1] sm:$0xff]  ;;  %v437_v40 = vor.u32 %v489_v38, %v436_v37  ;;  %v438_v41 = vld [vmem:[%s734_s3 + $0x38] sm:$0xf0]  ;;  %v487_v44 = vld [vmem:[%s734_s3 + $0x24] sm:$0xf0]  ;;  %vm313_vm2 = vcmask 1045508  }
   0xe   :  { %105 = vmatpush.bf16.msra.mxu0 %v478_v7  ;;  %268 = vmatpush.bf16.msra.mxu1 %v461_v22  ;;  %v441_v42 = vor.u32 %v488_v39, %v438_v41  ;;  %v428_v43 = vld [vmem:[%s734_s3 + $0x20] sm:$0xf]  ;;  %v486_v45 = vld [vmem:[%s734_s3 + $0x24] sm:$0xf]  ;;  %v430_v47 = vld [vmem:[%s734_s3 + $0x28] sm:$0xf0] }
   0xf   :  { %281 = vmatpush.bf16.msra.mxu2 %v465_v24  ;;  %v429_v46 = vor.u32 %v487_v44, %v428_v43  ;;  %v433_v48 = vor.u32 %v486_v45, %v430_v47  ;;  %v122_v49 = vld [vmem:[%s733_s2] sm:$0x3]  ;;  %v420_v50 = vld [vmem:[%s734_s3 + $0x10] sm:$0xf]  ;;  %v485_v51 = vld [vmem:[%s734_s3 + $0x14] sm:$0xf0] }
  0x10   :  { %v484_v52 = vld [vmem:[%s734_s3 + $0x14] sm:$0xf]  ;;  %v421_v53 = vor.u32 %v485_v51, %v420_v50  ;;  %v422_v54 = vld [vmem:[%s734_s3 + $0x18] sm:$0xf0]  ;;  %v412_v55 = vld [vmem:[%s734_s3] sm:$0xf] }
  0x11   :  { %v483_v56 = vld [vmem:[%s734_s3 + $0x4] sm:$0xf0]  ;;  %v425_v57 = vor.u32 %v484_v52, %v422_v54  ;;  %v482_v58 = vld [vmem:[%s734_s3 + $0x4] sm:$0xf]  ;;  %v414_v59 = vld [vmem:[%s734_s3 + $0x8] sm:$0xf0] }
  0x12   :  { %106 = vmatpush.bf16.msra.mxu0 %v477_v8  ;;  %269 = vmatpush.bf16.msra.mxu1 %v453_v28  ;;  %v413_v61 = vor.u32 %v483_v56, %v412_v55  ;;  %v417_v62 = vor.u32 %v482_v58, %v414_v59  ;;  %v181_v33 = vld [vmem:[%s735_s4] sm:$0x3]  ;;  %vm316_vm3 = vcmask 1045504   ;;  %s549_s4 = smov [#allocation2]   ;;  %s369_s30 = sshll.u32 %s736_s5, 4  ;;  %s370_s30 = int_to_ptr.hbm [resolvable:$true] %s369_s30 }
  0x13   :  { %282 = vmatpush.bf16.msra.mxu2 %v457_v30  ;;  %v184_v38 = vperm.slane %v181_v33, 1  ;;  %s367_s27 = sshll.u32 %s549_s4, 4  ;;  %s368_s27 = int_to_ptr.vmem [resolvable:$true] %s367_s27 }
  0x16   :  { %107 = vmatpush.bf16.msra.mxu0 %v476_v9  ;;  %270 = vmatpush.bf16.msra.mxu1 %v445_v34  ;;  %v183_v34 = vperm.slane %v181_v33, 0 }
  0x17   :  { %283 = vmatpush.bf16.msra.mxu2 %v449_v36 }
  0x1a   :  { %108 = vmatpush.bf16.msra.mxu0 %v475_v10  ;;  %271 = vmatpush.bf16.msra.mxu1 %v437_v40 }
  0x1b   :  { %284 = vmatpush.bf16.msra.mxu2 %v441_v42 }
  0x1e   :  { %109 = vmatpush.bf16.msra.mxu0 %v474_v11  ;;  %272 = vmatpush.bf16.msra.mxu1 %v429_v46 }
  0x1f   :  { %285 = vmatpush.bf16.msra.mxu2 %v433_v48 }
  0x21   :  { %110 = vmatmul.bf16.vlgmr.msra.gmra.mxu0 %v52_v12 }
  0x22   :  { %273 = vmatpush.bf16.msra.mxu1 %v421_v53 }
  0x23   :  { %286 = vmatpush.bf16.msra.mxu2 %v425_v57 }
  0x26   :  { %274 = vmatpush.bf16.msra.mxu1 %v413_v61 }
  0x27   :  { %287 = vmatpush.bf16.msra.mxu2 %v417_v62 }
  0x9e   :  { %v111_v60 = vpop.f32.mrf.mxu0 }
  0x9f   :  { %v116_v63 = vrot.slane %v111_v60, 2  ;;  %v117_v0 = vrot.slane %v111_v60, 4  ;;  %v118_v1 = vrot.slane %v111_v60, 6  ;;  %v123_v2 = vadd.f32 %v122_v49, %v111_v60 }
  0xa1   :  { %v124_v3 = vadd.f32 %v122_v49, %v116_v63  ;;  %v125_v4 = vadd.f32 %v122_v49, %v117_v0  ;;  %v126_v5 = vadd.f32 %v122_v49, %v118_v1  ;;  %v127_v6 = vsub.f32 0.0, %v123_v2 }
  0xa3   :  { %v128_v7 = vsub.f32 0.0, %v124_v3  ;;  %v129_v8 = vsub.f32 0.0, %v125_v4  ;;  %v130_v9 = vsub.f32 0.0, %v126_v5  ;;  %v131_v10 = vmul.f32 1.442695, %v127_v6 }
  0xa5   :  { %499 = vpow2.f32 %v131_v10  ;;  %v133_v11 = vmul.f32 1.442695, %v128_v7  ;;  %v135_v12 = vmul.f32 1.442695, %v129_v8  ;;  %v137_v13 = vmul.f32 1.442695, %v130_v9 }
  0xa6   :  { %v113_v14 = vpop.f32.mrf.mxu0 }
  0xa7   :  { %501 = vpow2.f32 %v133_v11 }
  0xa8   :  { %503 = vpow2.f32 %v135_v12 }
  0xa9   :  { %505 = vpow2.f32 %v137_v13 }
  0xab   :  { %v500_v15 = vpop.eup %499 }
  0xac   :  { %v139_v16 = vadd.f32 1.0, %v500_v15 }
  0xad   :  { %v502_v17 = vpop.eup %501 }
  0xae   :  { %v504_v18 = vpop.eup %503  ;;  %v140_v19 = vadd.f32 1.0, %v502_v17  ;;  %507 = vrcp.f32 %v139_v16 }
  0xaf   :  { %v506_v20 = vpop.eup %505  ;;  %v141_v21 = vadd.f32 1.0, %v504_v18 }
  0xb0   :  { %v142_v22 = vadd.f32 1.0, %v506_v20  ;;  %509 = vrcp.f32 %v140_v19 }
  0xb1   :  { %511 = vrcp.f32 %v141_v21 }
  0xb2   :  { %513 = vrcp.f32 %v142_v22 }
  0xb4   :  { %v508_v23 = vpop.eup %507 }
  0xb5   :  { %v147_v24 = vmul.f32 %v508_v23, %v123_v2 }
  0xb6   :  { %v510_v25 = vpop.eup %509 }
  0xb7   :  { %v512_v26 = vpop.eup %511  ;;  %v148_v27 = vmul.f32 %v510_v25, %v124_v3  ;;  %155 = vst [vmem:[#allocation1] ss:$4 sm:$0xff] %v147_v24 }
  0xb8   :  { %v514_v28 = vpop.eup %513  ;;  %v149_v29 = vmul.f32 %v512_v26, %v125_v4 }
  0xb9   :  { %v150_v30 = vmul.f32 %v514_v28, %v126_v5  ;;  %157 = vst [vmem:[#allocation1 + $0x1] ss:$4 sm:$0xff] %v148_v27 }
  0xba   :  { %159 = vst [vmem:[#allocation1 + $0x2] ss:$4 sm:$0xff] %v149_v29 }
  0xbb   :  { %161 = vst [vmem:[#allocation1 + $0x3] ss:$4 sm:$0xff] %v150_v30 }
  0xc2   :  { %v162_v31 = vld.sshfl [vmem:[#allocation1] sm:$0xff pattern:$0x73625140] }
  0xc3   :  { %v164_v32 = vpack.c.bf16 %v162_v31, %v162_v31 }
  0xc5   :  { %275 = vmatmul.bf16.vlgmr.msra.gmra.mxu1 %v164_v32  ;;  %288 = vmatmul.bf16.vlgmr.msra.gmra.mxu2 %v164_v32 }
 0x142   :  { %v276_v35 = vpop.f32.mrf.mxu1 }
 0x143   :  { %v277_v36 = vadd.f32 %v276_v35, %v183_v34 }
 0x145   :  { %v293_v37 = vsub.f32 0.0, %v277_v36 }
 0x147   :  { %v295_v39 = vmul.f32 1.442695, %v293_v37 }
 0x148   :  { %v289_v40 = vpop.f32.mrf.mxu2 }
 0x149   :  { %v290_v41 = vadd.f32 %v289_v40, %v184_v38  ;;  %515 = vpow2.f32 %v295_v39 }
 0x14a   :  { %v278_v42 = vpop.f32.mrf.mxu1 }
 0x14b   :  { %v294_v43 = vsub.f32 0.0, %v290_v41 }
 0x14d   :  { %v297_v44 = vmul.f32 1.442695, %v294_v43 }
 0x14f   :  { %517 = vpow2.f32 %v297_v44  ;;  %v516_v45 = vpop.eup %515 }
 0x150   :  { %v291_v46 = vpop.f32.mrf.mxu2  ;;  %v299_v47 = vadd.f32 1.0, %v516_v45 }
 0x152   :  { %519 = vrcp.f32 %v299_v47 }
 0x155   :  { %v518_v48 = vpop.eup %517 }
 0x156   :  { %v300_v49 = vadd.f32 1.0, %v518_v48 }
 0x158   :  { %521 = vrcp.f32 %v300_v49  ;;  %v520_v50 = vpop.eup %519 }
 0x159   :  { %v303_v53 = vmul.f32 %v520_v50, %v277_v36 }
 0x15e   :  { %v522_v51 = vpop.eup %521 }
 0x15f   :  { %v304_v52 = vmul.f32 %v522_v51, %v290_v41 }
 0x161   :  { %v307_v54 = vrot.slane %v304_v52, 6 }
 0x163   :  { %v309_v55 = vsel %vm308_vm0, %v303_v53, %v307_v54  ;;  %v311_v56 = vsel %vm310_vm1, %v303_v53, %v307_v54  ;;  %v314_v58 = vsel %vm313_vm2, %v303_v53, %v307_v54  ;;  %v317_v59 = vsel %vm316_vm3, %v307_v54, %v303_v53 }
 0x164   :  { %v312_v57 = vrot.slane %v311_v56, 2  ;;  %319 = vst [vmem:[#allocation1] ss:$4 sm:$0xff] %v309_v55  ;;  %v315_v60 = vrot.slane %v314_v58, 4  ;;  %v318_v63 = vrot.slane %v317_v59, 6 }
 0x166   :  { %323 = vst [vmem:[#allocation1 + $0x20] ss:$4 sm:$0xff] %v312_v57 }
 0x16b   :  { %v320_v61 = vld.sshfl [vmem:[#allocation1] sm:$0xff pattern:$0x73625140]  ;;  %v321_v62 = vld.sshfl [vmem:[#allocation1 + $0x8] sm:$0xff pattern:$0x73625140] }
 0x16c   :  { %326 = vst [vmem:[#allocation1] ss:$4 sm:$0xff] %v315_v60  ;;  %v340_v4 = vsel %vm308_vm0, %v320_v61, 0.0  ;;  %v347_v5 = vsel %vm308_vm0, %v321_v62, 0.0 }
 0x16d   :  { %v324_v0 = vld.sshfl [vmem:[#allocation1 + $0x20] sm:$0xff pattern:$0x73625140]  ;;  %v325_v1 = vld.sshfl [vmem:[#allocation1 + $0x28] sm:$0xff pattern:$0x73625140] }
 0x16e   :  { %329 = vst [vmem:[#allocation1 + $0x20] ss:$4 sm:$0xff] %v318_v63  ;;  %v341_v2 = vsel %vm308_vm0, %v324_v0, 0.0  ;;  %v348_v3 = vsel %vm308_vm0, %v325_v1, 0.0 }
 0x16f   :  { %v342_v8 = vadd.f32 %v341_v2, %v340_v4  ;;  %v349_v9 = vadd.f32 %v348_v3, %v347_v5 }
 0x173   :  { %v327_v6 = vld.sshfl [vmem:[#allocation1] sm:$0xff pattern:$0x73625140]  ;;  %v328_v7 = vld.sshfl [vmem:[#allocation1 + $0x8] sm:$0xff pattern:$0x73625140] }
 0x174   :  { %v343_v10 = vsel %vm308_vm0, %v327_v6, 0.0  ;;  %v350_v11 = vsel %vm308_vm0, %v328_v7, 0.0 }
 0x175   :  { %v330_v12 = vld.sshfl [vmem:[#allocation1 + $0x20] sm:$0xff pattern:$0x73625140]  ;;  %v331_v13 = vld.sshfl [vmem:[#allocation1 + $0x28] sm:$0xff pattern:$0x73625140]  ;;  %v344_v14 = vadd.f32 %v343_v10, %v342_v8  ;;  %v351_v15 = vadd.f32 %v350_v11, %v349_v9 }
 0x176   :  { %v345_v16 = vsel %vm308_vm0, %v330_v12, 0.0  ;;  %v352_v17 = vsel %vm308_vm0, %v331_v13, 0.0 }
 0x177   :  { %v346_v18 = vadd.f32 %v345_v16, %v344_v14  ;;  %v353_v19 = vadd.f32 %v352_v17, %v351_v15 }
 0x179   :  { %v355_v20 = vmul.f32 0.25, %v353_v19  ;;  %v354_v21 = vmul.f32 0.25, %v346_v18 }
 0x17b   :  { %v358_v22 = vrot.slane %v355_v20, 6 }
 0x17d   :  { %v359_v23 = vsel %vm308_vm0, %v354_v21, %v358_v22 }
 0x17e   :  { %361 = vst [vmem:[#allocation2] sm:$0xf] %v359_v23 }
 0x17f   :  { %372 = dma.vmem_to_hbm [thread:$0]  %s368_s27, 64, %s370_s30, [#allocation3]  }
 0x180   :  { %547 = dma.done.wait [#allocation3], 64  }
 0x181   :  { %548 = vsyncadd [#allocation3], 4294967232 }
 0x182   :  { %377 = vsyncpa [#allocation3], 1 }

</bundles_post_ra>
